<compile_context>
chip_gen: v5e
topology: v5e:2x2
jax: 0.10.0
libtpu: 0.0.40
codegen_flags: <defaults>
</compile_context>

<pallas_src>
import functools

import jax
import jax.numpy as jnp
from jax import lax
from jax.experimental import pallas as pl
from jax.experimental.pallas import tpu as pltpu

_LANE = 128
_SUBLANE = 8

# Per-generation (preferred query tile, preferred scoped-VMEM limit, assumed
# physical VMEM per TensorCore).
_GEN_CONFIG = {
    "v5":      (128,  64 * 2**20, 128 * 2**20),
    "v6":      (256, 100 * 2**20, 128 * 2**20),
    "v7":      (256,  48 * 2**20,  64 * 2**20),
    "unknown": (128,  48 * 2**20,  64 * 2**20),
}


def _round_up(v, m):
    return ((v + m - 1) // m) * m


def _tpu_generation():
    try:
        kind = jax.devices()[0].device_kind.lower()
    except Exception:
        return "unknown"
    if "v5" in kind:
        return "v5"
    if "v6" in kind:
        return "v6"
    if "v7" in kind or "7x" in kind:
        return "v7"
    return "unknown"


@functools.lru_cache(maxsize=None)
def _supports_buffered_weights():
    """One-time capability probe for pipeline_mode=pl.Buffered(1).

    Narrow and outside the hot path: a failure here only disables the
    single-buffered-weights optimization; real errors in the main attention
    kernel are never swallowed.
    """
    def _probe(a_ref, o_ref):
        o_ref[...] = a_ref[...]

    try:
        x = jnp.zeros((8, 128), jnp.float32)
        fn = pl.pallas_call(
            _probe,
            out_shape=jax.ShapeDtypeStruct((8, 128), jnp.float32),
            grid=(1,),
            in_specs=[pl.BlockSpec((8, 128), lambda i: (0, 0),
                                   pipeline_mode=pl.Buffered(1))],
            out_specs=pl.BlockSpec((8, 128), lambda i: (0, 0)),
        )
        jax.block_until_ready(fn(x))
        return True
    except Exception:
        return False


def _vmem_footprint(n_pad, C, H, hd, TQ, out_itemsize, single_buffer_weights):
    """Rough (8,128)-tiled VMEM footprint estimate in bytes."""
    wmult = 1 if single_buffer_weights else 2
    x_block = 2 * _round_up(n_pad, _SUBLANE) * _round_up(C, _LANE) * 2       # bf16 x, 2 bufs
    weights = wmult * (
        _round_up(C, _SUBLANE) * _round_up(C, _LANE) * 2 +                   # W_q  bf16
        _round_up(C, _SUBLANE) * _round_up(2 * C, _LANE) * 2 +               # W_kv bf16
        _round_up(C, _SUBLANE) * _round_up(C, _LANE) * 2 +                   # W_p  bf16
        _SUBLANE * _round_up(C, _LANE) * 4)                                  # bias f32
    out_block = 2 * _round_up(TQ, _SUBLANE) * _round_up(C, _LANE) * out_itemsize
    k_scr = H * _round_up(hd, _SUBLANE) * _round_up(n_pad, _LANE) * 2        # (H,hd,N) bf16
    v_scr = H * _round_up(n_pad, _SUBLANE) * _round_up(hd, _LANE) * 2        # (H,N,hd) bf16
    ctx_scr = _round_up(TQ, _SUBLANE) * _round_up(C, _LANE) * 2              # (TQ,C) bf16
    slab = 4 * _round_up(TQ, _SUBLANE) * _round_up(n_pad, _LANE) * 4         # f32 score temps
    return x_block + weights + out_block + k_scr + v_scr + ctx_scr + slab


def _attention_kernel(x_ref, wq_ref, wkv_ref, wp_ref, b_ref, o_ref,
                      k_heads, v_heads, ctx_scratch,
                      *, num_heads, scale, n_actual, head_group):
    qi = pl.program_id(1)
    n_pad, C = x_ref.shape[1], x_ref.shape[2]
    TQ = o_ref.shape[1]
    H = num_heads
    hd = C // H

    # ---- K/V projection for the whole (padded) sequence: once per batch. ----
    @pl.when(qi == 0)
    def _():
        xf = x_ref[0]                                                        # (n_pad, C) bf16
        # Single fused (n_pad, C) x (C, 2C) GEMM for K and V.
        kv = jnp.dot(xf, wkv_ref[...], preferred_element_type=jnp.float32)  # (n_pad, 2C)
        for h in range(H):
            sl = slice(h * hd, (h + 1) * hd)
            # K stored transposed (hd, n_pad): lane-dense scratch (no hd->128
            # lane padding) and QK^T below is a plain (TQ,hd)x(hd,n_pad) matmul.
            k_heads[h] = kv[:, sl].T.astype(jnp.bfloat16)
            v_heads[h] = kv[:, C + h * hd: C + (h + 1) * hd].astype(jnp.bfloat16)

    # ---- Q projection for this query tile (scale hoisted out of head loop). ----
    row0 = pl.multiple_of(qi * TQ, TQ)
    xq = x_ref[0, pl.ds(row0, TQ), :]                                        # (TQ, C) bf16
    q_full = jnp.dot(xq, wq_ref[...], preferred_element_type=jnp.float32) * scale

    # ---- Key-padding mask (only present when the wrapper padded N). ----
    if n_actual != n_pad:
        col = lax.broadcasted_iota(jnp.int32, (1, n_pad), 1)
        neg_mask = jnp.where(col < n_actual, 0.0, -1e30).astype(jnp.float32)
    else:
        neg_mask = None

    # ---- Per-head attention. Heads processed in groups whose combined context
    #      width is a 128-lane multiple -> full-width ctx_scratch stores. ----
    for g in range(H // head_group):
        pieces = []
        for j in range(head_group):
            h = g * head_group + j
            qh = q_full[:, h * hd:(h + 1) * hd].astype(jnp.bfloat16)         # (TQ, hd)
            s = jnp.dot(qh, k_heads[h],
                        preferred_element_type=jnp.float32)                  # (TQ, n_pad)
            if neg_mask is not None:
                s = s + neg_mask
            # Numerically stable softmax; statistics in f32 (v5e-safe).
            m = jnp.max(s, axis=-1, keepdims=True)
            e = jnp.exp(s - m)
            denom = jnp.sum(e, axis=-1, keepdims=True)
            # Deferred normalization: contract unnormalized probabilities with V,
            # then scale the small (TQ, hd) result (not the (TQ, n_pad) slab).
            ctx_h = jnp.dot(e.astype(jnp.bfloat16), v_heads[h],
                            preferred_element_type=jnp.float32)              # (TQ, hd)
            ctx_h = ctx_h * pl.reciprocal(denom, approx=True)
            # attn_drop is identity (p = 0.0)
            pieces.append(ctx_h)
        slab = pieces[0] if head_group == 1 else jnp.concatenate(pieces, axis=-1)
        gw = head_group * hd
        ctx_scratch[:, g * gw:(g + 1) * gw] = slab.astype(jnp.bfloat16)

    # ---- Output projection (one lane-dense GEMM) + bias.  proj_drop identity. ----
    out = jnp.dot(ctx_scratch[...], wp_ref[...], preferred_element_type=jnp.float32)
    out = out + b_ref[...]                                                   # (1, C) broadcast
    o_ref[0] = out.astype(o_ref.dtype)


def attention_pallas(x, w_qkv, w_proj, b_proj, *, num_heads, scale=None, q_tile=None):
    """x: (B, N, C); w_qkv: (C, 3C) pre-transposed; w_proj: (C, C); b_proj: (C,)."""
    B, N, C = x.shape
    assert C % num_heads == 0, "dim must be divisible by num_heads"
    hd = C // num_heads
    if scale is None:
        scale = hd ** (-0.5)

    gen = _tpu_generation()
    tq_pref, limit_pref, phys_vmem = _GEN_CONFIG[gen]

    # Query-tile selection: generation preference (256 on v6e/v7x, 128 on v5e),
    # clamped to the (8-aligned) sequence length; N is padded to a multiple.
    TQ = q_tile if q_tile is not None else tq_pref
    TQ = max(_SUBLANE, _round_up(min(TQ, _round_up(N, _SUBLANE)), _SUBLANE))
    n_pad = _round_up(N, TQ)

    single_buffer_weights = _supports_buffered_weights()
    budget = int(0.85 * phys_vmem)
    fp = _vmem_footprint(n_pad, C, num_heads, hd, TQ, x.dtype.itemsize,
                         single_buffer_weights)
    # Gate the large tile on the per-shape VMEM footprint (matters on v7x's
    # 64 MiB per-TC VMEM at long N); only shrink when the user didn't fix TQ.
    while q_tile is None and TQ > 128 and fp > budget:
        TQ //= 2
        n_pad = _round_up(N, TQ)
        fp = _vmem_footprint(n_pad, C, num_heads, hd, TQ, x.dtype.itemsize,
                             single_buffer_weights)
    # TODO(synk): if fp still exceeds the budget at TQ=128 (very long N on v7x),
    # stream the qi==0 K/V projection from a pl.ANY x ref with chunked manual DMA
    # instead of keeping the full (1, n_pad, C) x block resident.
    vmem_limit = min(budget, max(limit_pref, int(fp * 1.25)))

    num_q_tiles = n_pad // TQ

    # Group heads so each ctx_scratch store spans a 128-lane-aligned full slab
    # (e.g. hd=64 -> pairs); fall back to per-head stores otherwise.
    if hd < _LANE and _LANE % hd == 0 and num_heads % (_LANE // hd) == 0:
        head_group = _LANE // hd
    else:
        head_group = 1

    # Pre-cast x to bf16 in the wrapper (numerically identical: the kernel
    # consumes it only as a bf16 matmul operand) -> halves the resident x block.
    x_bf16 = x.astype(jnp.bfloat16)
    if n_pad != N:
        x_bf16 = jnp.pad(x_bf16, ((0, 0), (0, n_pad - N), (0, 0)))

    # Split the fused QKV weight: separate Q weight + fused K/V weight (C, 2C),
    # all pre-cast to bf16 (halves weight VMEM/DMA footprint).
    w_q = w_qkv[:, 0:C].astype(jnp.bfloat16)
    w_kv = w_qkv[:, C:3 * C].astype(jnp.bfloat16)
    w_p = w_proj.astype(jnp.bfloat16)
    b_p = b_proj.reshape(1, C).astype(jnp.float32)

    def _weight_spec(shape):
        imap = lambda b, q: (0, 0)              # loop-invariant: never re-DMA'd
        if single_buffer_weights:
            return pl.BlockSpec(shape, imap, pipeline_mode=pl.Buffered(1))
        return pl.BlockSpec(shape, imap)

    kernel = functools.partial(_attention_kernel, num_heads=num_heads,
                               scale=float(scale), n_actual=N,
                               head_group=head_group)

    out = pl.pallas_call(
        kernel,
        out_shape=jax.ShapeDtypeStruct((B, n_pad, C), x.dtype),
        grid_spec=pltpu.PrefetchScalarGridSpec(
            num_scalar_prefetch=0,
            grid=(B, num_q_tiles),
            in_specs=[
                pl.BlockSpec((1, n_pad, C), lambda b, q: (b, 0, 0)),  # x (bf16)
                _weight_spec((C, C)),                                 # W_q
                _weight_spec((C, 2 * C)),                             # W_kv (fused)
                _weight_spec((C, C)),                                 # W_proj
                _weight_spec((1, C)),                                 # b_proj
            ],
            out_specs=pl.BlockSpec((1, TQ, C), lambda b, q: (b, q, 0)),
            scratch_shapes=[
                pltpu.VMEM((num_heads, hd, n_pad), jnp.bfloat16),     # K^T, lane-dense
                pltpu.VMEM((num_heads, n_pad, hd), jnp.bfloat16),     # V, head-split
                pltpu.VMEM((TQ, C), jnp.bfloat16),                    # ctx assembly
            ],
        ),
        compiler_params=pltpu.CompilerParams(
            # The q axis MUST remain "arbitrary": qi==0 initializes the K/V
            # scratch reused by later query tiles (sequential iteration).
            # TODO(synk): on v7x (2 TCs/chip) a B=1 call uses only one core;
            # splitting the q axis across cores would require duplicating the
            # qi==0 K/V projection per core (core_map), not done here.
            dimension_semantics=("parallel", "arbitrary"),
            vmem_limit_bytes=vmem_limit),
    )(x_bf16, w_q, w_kv, w_p, b_p)

    return out if n_pad == N else out[:, :N, :]


def attention_reference(x, w_qkv, w_proj, b_proj, *, num_heads, scale):
    """Pure-JAX f32 reference mirroring the PyTorch forward exactly."""
    B, N, C = x.shape
    hd = C // num_heads
    qkv = jnp.einsum("bnc,cd->bnd", x, w_qkv)                   # (B, N, 3C)
    qkv = qkv.reshape(B, N, 3, num_heads, hd).transpose(2, 0, 3, 1, 4)
    q, k, v = qkv[0], qkv[1], qkv[2]                            # (B, H, N, hd)
    attn = jnp.einsum("bhnd,bhmd->bhnm", q * scale, k)
    attn = jax.nn.softmax(attn, axis=-1)
    ctx = jnp.einsum("bhnm,bhmd->bhnd", attn, v)                # (B, H, N, hd)
    ctx = ctx.transpose(0, 2, 1, 3).reshape(B, N, C)
    return jnp.einsum("bnc,cd->bnd", ctx, w_proj) + b_proj


if __name__ == "__main__":
    # Small deterministic config consistent with the module's forward.
    B, N, C = 2, 16, 32
    num_heads = 4
    head_dim = C // num_heads
    scale = head_dim ** (-0.5)          # qk_scale=None -> head_dim ** -0.5

    key = jax.random.PRNGKey(0)
    kx, kqkv, kproj, kb = jax.random.split(key, 4)

    x = jax.random.normal(kx, (B, N, C), dtype=jnp.float32)
    # nn.Linear(dim, 3*dim, bias=False): weight stored pre-transposed as (C, 3C).
    w_qkv = jax.random.normal(kqkv, (C, 3 * C), dtype=jnp.float32) * (C ** -0.5)
    # nn.Linear(dim, dim): weight pre-transposed (C, C) + bias (C,).
    w_proj = jax.random.normal(kproj, (C, C), dtype=jnp.float32) * (C ** -0.5)
    b_proj = jax.random.normal(kb, (C,), dtype=jnp.float32) * 0.1

    # Case 1: q_tile=8 forces a 2-tile query grid even at this toy sequence
    # length, exercising the K/V-scratch-reuse (qi > 0) path.
    out = attention_pallas(x, w_qkv, w_proj, b_proj,
                           num_heads=num_heads, scale=scale, q_tile=8)
    out = jax.block_until_ready(out)
    ref = attention_reference(x, w_qkv, w_proj, b_proj,
                              num_heads=num_heads, scale=scale)
    assert out.shape == (B, N, C)
    # bf16 matmul operands + approx-reciprocal softmax: compare loosely vs f32 ref.
    assert jnp.allclose(out, ref, atol=5e-2, rtol=5e-2), "mismatch vs JAX reference"

    # Case 2: ragged sequence length (N not a multiple of the tile) exercises
    # the wrapper padding + in-kernel key-mask path.
    N2 = 13
    x2 = x[:, :N2, :]
    out2 = attention_pallas(x2, w_qkv, w_proj, b_proj,
                            num_heads=num_heads, scale=scale, q_tile=8)
    out2 = jax.block_until_ready(out2)
    ref2 = attention_reference(x2, w_qkv, w_proj, b_proj,
                               num_heads=num_heads, scale=scale)
    assert out2.shape == (B, N2, C)
    assert jnp.allclose(out2, ref2, atol=5e-2, rtol=5e-2), "ragged-N mismatch"

    print("KERNEL_OK")
</pallas_src>

<mosaic_0001>
module attributes {stable_mosaic.version = 11 : i64} {
  func.func @_probe(%arg0: i32, %arg1: memref<8x128xf32, #tpu.memory_space<vmem>>, %arg2: memref<8x128xf32, #tpu.memory_space<vmem>>) attributes {dimension_semantics = [#tpu.dimension_semantics<arbitrary>], iteration_bounds = array<i64: 1>, scalar_prefetch = 0 : i64, scratch_operands = 0 : i64, tpu.core_type = #tpu.core_type<tc>, window_params = [{pipeline_mode = #tpu.pipeline_mode<synchronous>, transform_indices = @transform_0, window_bounds = array<i64: 8, 128>}, {pipeline_mode = #tpu.pipeline_mode<synchronous>, transform_indices = @transform_1, window_bounds = array<i64: 8, 128>}]} {
    %c0 = arith.constant 0 : index
    %c0_0 = arith.constant 0 : index
    %0 = vector.load %arg1[%c0, %c0_0] : memref<8x128xf32, #tpu.memory_space<vmem>>, vector<8x128xf32>
    %c0_1 = arith.constant 0 : index
    %c0_2 = arith.constant 0 : index
    %1 = vector.load %arg2[%c0_1, %c0_2] : memref<8x128xf32, #tpu.memory_space<vmem>>, vector<8x128xf32>
    tpu.vector_store %arg2[%c0_1, %c0_2], %0 {strides = array<i32>} : memref<8x128xf32, #tpu.memory_space<vmem>>, vector<8x128xf32>,
    return
  }
  func.func @transform_0(%arg0: i32) -> (i32, i32) {
    %c0_i32 = arith.constant 0 : i32
    %c0_i32_0 = arith.constant 0 : i32
    %c0_i32_1 = arith.constant 0 : i32
    return %c0_i32, %c0_i32_0 : i32, i32
  }
  func.func @transform_1(%arg0: i32) -> (i32, i32) {
    %c0_i32 = arith.constant 0 : i32
    %c0_i32_0 = arith.constant 0 : i32
    %c0_i32_1 = arith.constant 0 : i32
    return %c0_i32, %c0_i32_0 : i32, i32
  }
}

module attributes {stable_mosaic.version = 11 : i64} {
  func.func @_attention_kernel(%arg0: i32, %arg1: i32, %arg2: memref<1x16x32xbf16, #tpu.memory_space<vmem>>, %arg3: memref<32x32xbf16, #tpu.memory_space<vmem>>, %arg4: memref<32x64xbf16, #tpu.memory_space<vmem>>, %arg5: memref<32x32xbf16, #tpu.memory_space<vmem>>, %arg6: memref<1x32xf32, #tpu.memory_space<vmem>>, %arg7: memref<1x8x32xf32, #tpu.memory_space<vmem>>, %arg8: memref<4x8x16xbf16, #tpu.memory_space<vmem>>, %arg9: memref<4x16x8xbf16, #tpu.memory_space<vmem>>, %arg10: memref<8x32xbf16, #tpu.memory_space<vmem>>) attributes {dimension_semantics = [#tpu.dimension_semantics<parallel>, #tpu.dimension_semantics<arbitrary>], iteration_bounds = array<i64: 2, 2>, scalar_prefetch = 0 : i64, scratch_operands = 3 : i64, tpu.core_type = #tpu.core_type<tc>, window_params = [{transform_indices = @transform_0, window_bounds = array<i64: 1, 16, 32>}, {pipeline_mode = #tpu.pipeline_mode<synchronous>, transform_indices = @transform_1, window_bounds = array<i64: 32, 32>}, {pipeline_mode = #tpu.pipeline_mode<synchronous>, transform_indices = @transform_2, window_bounds = array<i64: 32, 64>}, {pipeline_mode = #tpu.pipeline_mode<synchronous>, transform_indices = @transform_3, window_bounds = array<i64: 32, 32>}, {pipeline_mode = #tpu.pipeline_mode<synchronous>, transform_indices = @transform_4, window_bounds = array<i64: 1, 32>}, {transform_indices = @transform_5, window_bounds = array<i64: 1, 8, 32>}]} {
    %c0_i32 = arith.constant 0 : i32
    %0 = arith.cmpi eq, %arg1, %c0_i32 : i32
    %1 = arith.extui %0 : i1 to i32
    %c0_i32_0 = arith.constant 0 : i32
    %2 = arith.cmpi ne, %1, %c0_i32_0 : i32
    scf.if %2 {
      %c0_57 = arith.constant 0 : index
      %c0_58 = arith.constant 0 : index
      %c0_59 = arith.constant 0 : index
      %105 = vector.load %arg2[%c0_57, %c0_58, %c0_59] : memref<1x16x32xbf16, #tpu.memory_space<vmem>>, vector<1x16x32xbf16>
      %106 = vector.shape_cast %105 : vector<1x16x32xbf16> to vector<16x32xbf16>
      %c0_60 = arith.constant 0 : index
      %c0_61 = arith.constant 0 : index
      %107 = vector.load %arg4[%c0_60, %c0_61] : memref<32x64xbf16, #tpu.memory_space<vmem>>, vector<32x64xbf16>
      %cst_62 = arith.constant dense<0.000000e+00> : vector<16x64xf32>
      %108 = tpu.matmul %106, %107, %cst_62 {dimension_numbers = #tpu.dot_dimension_numbers<[1], [0], [0], [1], [0, 0, 1, 1], [], []>} : vector<16x32xbf16>, vector<32x64xbf16>, vector<16x64xf32> -> vector<16x64xf32>
      %109 = vector.extract_strided_slice %108 {offsets = [0, 0], sizes = [16, 8], strides = [1, 1]} : vector<16x64xf32> to vector<16x8xf32>
      %110 = tpu.transpose %109, [1, 0] : vector<16x8xf32> -> vector<8x16xf32>
      %111 = arith.truncf %110 : vector<8x16xf32> to vector<8x16xbf16>
      %c0_63 = arith.constant 0 : index
      %c0_64 = arith.constant 0 : index
      %c0_65 = arith.constant 0 : index
      %112 = vector.load %arg8[%c0_63, %c0_64, %c0_65] : memref<4x8x16xbf16, #tpu.memory_space<vmem>>, vector<1x8x16xbf16>
      %113 = vector.shape_cast %112 : vector<1x8x16xbf16> to vector<8x16xbf16>
      %114 = vector.shape_cast %111 : vector<8x16xbf16> to vector<1x8x16xbf16>
      tpu.vector_store %arg8[%c0_63, %c0_64, %c0_65], %114 {strides = array<i32>} : memref<4x8x16xbf16, #tpu.memory_space<vmem>>, vector<1x8x16xbf16>,
      %115 = vector.extract_strided_slice %108 {offsets = [0, 32], sizes = [16, 8], strides = [1, 1]} : vector<16x64xf32> to vector<16x8xf32>
      %116 = arith.truncf %115 : vector<16x8xf32> to vector<16x8xbf16>
      %c0_66 = arith.constant 0 : index
      %c0_67 = arith.constant 0 : index
      %c0_68 = arith.constant 0 : index
      %117 = vector.load %arg9[%c0_66, %c0_67, %c0_68] : memref<4x16x8xbf16, #tpu.memory_space<vmem>>, vector<1x16x8xbf16>
      %118 = vector.shape_cast %117 : vector<1x16x8xbf16> to vector<16x8xbf16>
      %119 = vector.shape_cast %116 : vector<16x8xbf16> to vector<1x16x8xbf16>
      tpu.vector_store %arg9[%c0_66, %c0_67, %c0_68], %119 {strides = array<i32>} : memref<4x16x8xbf16, #tpu.memory_space<vmem>>, vector<1x16x8xbf16>,
      %120 = vector.extract_strided_slice %108 {offsets = [0, 8], sizes = [16, 8], strides = [1, 1]} : vector<16x64xf32> to vector<16x8xf32>
      %121 = tpu.transpose %120, [1, 0] : vector<16x8xf32> -> vector<8x16xf32>
      %122 = arith.truncf %121 : vector<8x16xf32> to vector<8x16xbf16>
      %c1_69 = arith.constant 1 : index
      %c0_70 = arith.constant 0 : index
      %c0_71 = arith.constant 0 : index
      %123 = vector.load %arg8[%c1_69, %c0_70, %c0_71] : memref<4x8x16xbf16, #tpu.memory_space<vmem>>, vector<1x8x16xbf16>
      %124 = vector.shape_cast %123 : vector<1x8x16xbf16> to vector<8x16xbf16>
      %125 = vector.shape_cast %122 : vector<8x16xbf16> to vector<1x8x16xbf16>
      tpu.vector_store %arg8[%c1_69, %c0_70, %c0_71], %125 {strides = array<i32>} : memref<4x8x16xbf16, #tpu.memory_space<vmem>>, vector<1x8x16xbf16>,
      %126 = vector.extract_strided_slice %108 {offsets = [0, 40], sizes = [16, 8], strides = [1, 1]} : vector<16x64xf32> to vector<16x8xf32>
      %127 = arith.truncf %126 : vector<16x8xf32> to vector<16x8xbf16>
      %c1_72 = arith.constant 1 : index
      %c0_73 = arith.constant 0 : index
      %c0_74 = arith.constant 0 : index
      %128 = vector.load %arg9[%c1_72, %c0_73, %c0_74] : memref<4x16x8xbf16, #tpu.memory_space<vmem>>, vector<1x16x8xbf16>
      %129 = vector.shape_cast %128 : vector<1x16x8xbf16> to vector<16x8xbf16>
      %130 = vector.shape_cast %127 : vector<16x8xbf16> to vector<1x16x8xbf16>
      tpu.vector_store %arg9[%c1_72, %c0_73, %c0_74], %130 {strides = array<i32>} : memref<4x16x8xbf16, #tpu.memory_space<vmem>>, vector<1x16x8xbf16>,
      %131 = vector.extract_strided_slice %108 {offsets = [0, 16], sizes = [16, 8], strides = [1, 1]} : vector<16x64xf32> to vector<16x8xf32>
      %132 = tpu.transpose %131, [1, 0] : vector<16x8xf32> -> vector<8x16xf32>
      %133 = arith.truncf %132 : vector<8x16xf32> to vector<8x16xbf16>
      %c2_75 = arith.constant 2 : index
      %c0_76 = arith.constant 0 : index
      %c0_77 = arith.constant 0 : index
      %134 = vector.load %arg8[%c2_75, %c0_76, %c0_77] : memref<4x8x16xbf16, #tpu.memory_space<vmem>>, vector<1x8x16xbf16>
      %135 = vector.shape_cast %134 : vector<1x8x16xbf16> to vector<8x16xbf16>
      %136 = vector.shape_cast %133 : vector<8x16xbf16> to vector<1x8x16xbf16>
      tpu.vector_store %arg8[%c2_75, %c0_76, %c0_77], %136 {strides = array<i32>} : memref<4x8x16xbf16, #tpu.memory_space<vmem>>, vector<1x8x16xbf16>,
      %137 = vector.extract_strided_slice %108 {offsets = [0, 48], sizes = [16, 8], strides = [1, 1]} : vector<16x64xf32> to vector<16x8xf32>
      %138 = arith.truncf %137 : vector<16x8xf32> to vector<16x8xbf16>
      %c2_78 = arith.constant 2 : index
      %c0_79 = arith.constant 0 : index
      %c0_80 = arith.constant 0 : index
      %139 = vector.load %arg9[%c2_78, %c0_79, %c0_80] : memref<4x16x8xbf16, #tpu.memory_space<vmem>>, vector<1x16x8xbf16>
      %140 = vector.shape_cast %139 : vector<1x16x8xbf16> to vector<16x8xbf16>
      %141 = vector.shape_cast %138 : vector<16x8xbf16> to vector<1x16x8xbf16>
      tpu.vector_store %arg9[%c2_78, %c0_79, %c0_80], %141 {strides = array<i32>} : memref<4x16x8xbf16, #tpu.memory_space<vmem>>, vector<1x16x8xbf16>,
      %142 = vector.extract_strided_slice %108 {offsets = [0, 24], sizes = [16, 8], strides = [1, 1]} : vector<16x64xf32> to vector<16x8xf32>
      %143 = tpu.transpose %142, [1, 0] : vector<16x8xf32> -> vector<8x16xf32>
      %144 = arith.truncf %143 : vector<8x16xf32> to vector<8x16xbf16>
      %c3_81 = arith.constant 3 : index
      %c0_82 = arith.constant 0 : index
      %c0_83 = arith.constant 0 : index
      %145 = vector.load %arg8[%c3_81, %c0_82, %c0_83] : memref<4x8x16xbf16, #tpu.memory_space<vmem>>, vector<1x8x16xbf16>
      %146 = vector.shape_cast %145 : vector<1x8x16xbf16> to vector<8x16xbf16>
      %147 = vector.shape_cast %144 : vector<8x16xbf16> to vector<1x8x16xbf16>
      tpu.vector_store %arg8[%c3_81, %c0_82, %c0_83], %147 {strides = array<i32>} : memref<4x8x16xbf16, #tpu.memory_space<vmem>>, vector<1x8x16xbf16>,
      %148 = vector.extract_strided_slice %108 {offsets = [0, 56], sizes = [16, 8], strides = [1, 1]} : vector<16x64xf32> to vector<16x8xf32>
      %149 = arith.truncf %148 : vector<16x8xf32> to vector<16x8xbf16>
      %c3_84 = arith.constant 3 : index
      %c0_85 = arith.constant 0 : index
      %c0_86 = arith.constant 0 : index
      %150 = vector.load %arg9[%c3_84, %c0_85, %c0_86] : memref<4x16x8xbf16, #tpu.memory_space<vmem>>, vector<1x16x8xbf16>
      %151 = vector.shape_cast %150 : vector<1x16x8xbf16> to vector<16x8xbf16>
      %152 = vector.shape_cast %149 : vector<16x8xbf16> to vector<1x16x8xbf16>
      tpu.vector_store %arg9[%c3_84, %c0_85, %c0_86], %152 {strides = array<i32>} : memref<4x16x8xbf16, #tpu.memory_space<vmem>>, vector<1x16x8xbf16>,
    } else {
    }
    %c8_i32 = arith.constant 8 : i32
    %3 = arith.muli %arg1, %c8_i32 : i32
    %4 = tpu.assume_multiple %3, 8 : i32
    %c0 = arith.constant 0 : index
    %5 = arith.index_cast %4 : i32 to index
    %c0_1 = arith.constant 0 : index
    %6 = vector.load %arg2[%c0, %5, %c0_1] : memref<1x16x32xbf16, #tpu.memory_space<vmem>>, vector<1x8x32xbf16>
    %7 = vector.shape_cast %6 : vector<1x8x32xbf16> to vector<8x32xbf16>
    %c0_2 = arith.constant 0 : index
    %c0_3 = arith.constant 0 : index
    %8 = vector.load %arg3[%c0_2, %c0_3] : memref<32x32xbf16, #tpu.memory_space<vmem>>, vector<32x32xbf16>
    %cst = arith.constant dense<0.000000e+00> : vector<8x32xf32>
    %9 = tpu.matmul %7, %8, %cst {dimension_numbers = #tpu.dot_dimension_numbers<[1], [0], [0], [1], [0, 0, 1, 1], [], []>} : vector<8x32xbf16>, vector<32x32xbf16>, vector<8x32xf32> -> vector<8x32xf32>
    %cst_4 = arith.constant 0.353553385 : f32
    %10 = vector.broadcast %cst_4 : f32 to vector<8x32xf32>
    %11 = arith.mulf %9, %10 : vector<8x32xf32>
    %12 = vector.extract_strided_slice %11 {offsets = [0, 0], sizes = [8, 8], strides = [1, 1]} : vector<8x32xf32> to vector<8x8xf32>
    %13 = arith.truncf %12 : vector<8x8xf32> to vector<8x8xbf16>
    %c0_5 = arith.constant 0 : index
    %c0_6 = arith.constant 0 : index
    %c0_7 = arith.constant 0 : index
    %14 = vector.load %arg8[%c0_5, %c0_6, %c0_7] : memref<4x8x16xbf16, #tpu.memory_space<vmem>>, vector<1x8x16xbf16>
    %15 = vector.shape_cast %14 : vector<1x8x16xbf16> to vector<8x16xbf16>
    %cst_8 = arith.constant dense<0.000000e+00> : vector<8x16xf32>
    %16 = tpu.matmul %13, %15, %cst_8 {dimension_numbers = #tpu.dot_dimension_numbers<[1], [0], [0], [1], [0, 0, 1, 1], [], []>} : vector<8x8xbf16>, vector<8x16xbf16>, vector<8x16xf32> -> vector<8x16xf32>
    %cst_9 = arith.constant dense<0xFF800000> : vector<8xf32>
    %17 = vector.multi_reduction <maximumf>, %16, %cst_9 [1] : vector<8x16xf32> to vector<8xf32>
    %18 = vector.shape_cast %17 : vector<8xf32> to vector<8x1xf32>
    %19 = vector.broadcast %18 : vector<8x1xf32> to vector<8x16xf32>
    %20 = arith.subf %16, %19 : vector<8x16xf32>
    %21 = math.exp %20 : vector<8x16xf32>
    %cst_10 = arith.constant dense<0.000000e+00> : vector<8xf32>
    %22 = vector.multi_reduction <add>, %21, %cst_10 [1] : vector<8x16xf32> to vector<8xf32>
    %23 = vector.shape_cast %22 : vector<8xf32> to vector<8x1xf32>
    %24 = arith.truncf %21 : vector<8x16xf32> to vector<8x16xbf16>
    %c0_11 = arith.constant 0 : index
    %c0_12 = arith.constant 0 : index
    %c0_13 = arith.constant 0 : index
    %25 = vector.load %arg9[%c0_11, %c0_12, %c0_13] : memref<4x16x8xbf16, #tpu.memory_space<vmem>>, vector<1x16x8xbf16>
    %26 = vector.shape_cast %25 : vector<1x16x8xbf16> to vector<16x8xbf16>
    %cst_14 = arith.constant dense<0.000000e+00> : vector<8x8xf32>
    %27 = tpu.matmul %24, %26, %cst_14 {dimension_numbers = #tpu.dot_dimension_numbers<[1], [0], [0], [1], [0, 0, 1, 1], [], []>} : vector<8x16xbf16>, vector<16x8xbf16>, vector<8x8xf32> -> vector<8x8xf32>
    %28 = tpu.reciprocal %23 {approx = true} : vector<8x1xf32> -> vector<8x1xf32>
    %29 = vector.broadcast %28 : vector<8x1xf32> to vector<8x8xf32>
    %30 = arith.mulf %27, %29 : vector<8x8xf32>
    %31 = arith.truncf %30 : vector<8x8xf32> to vector<8x8xbf16>
    %c0_15 = arith.constant 0 : index
    %c0_16 = arith.constant 0 : index
    %32 = vector.load %arg10[%c0_15, %c0_16] : memref<8x32xbf16, #tpu.memory_space<vmem>>, vector<8x8xbf16>
    tpu.vector_store %arg10[%c0_15, %c0_16], %31 {strides = array<i32>} : memref<8x32xbf16, #tpu.memory_space<vmem>>, vector<8x8xbf16>,
    %33 = vector.extract_strided_slice %11 {offsets = [0, 8], sizes = [8, 8], strides = [1, 1]} : vector<8x32xf32> to vector<8x8xf32>
    %34 = arith.truncf %33 : vector<8x8xf32> to vector<8x8xbf16>
    %c1 = arith.constant 1 : index
    %c0_17 = arith.constant 0 : index
    %c0_18 = arith.constant 0 : index
    %35 = vector.load %arg8[%c1, %c0_17, %c0_18] : memref<4x8x16xbf16, #tpu.memory_space<vmem>>, vector<1x8x16xbf16>
    %36 = vector.shape_cast %35 : vector<1x8x16xbf16> to vector<8x16xbf16>
    %cst_19 = arith.constant dense<0.000000e+00> : vector<8x16xf32>
    %37 = tpu.matmul %34, %36, %cst_19 {dimension_numbers = #tpu.dot_dimension_numbers<[1], [0], [0], [1], [0, 0, 1, 1], [], []>} : vector<8x8xbf16>, vector<8x16xbf16>, vector<8x16xf32> -> vector<8x16xf32>
    %cst_20 = arith.constant dense<0xFF800000> : vector<8xf32>
    %38 = vector.multi_reduction <maximumf>, %37, %cst_20 [1] : vector<8x16xf32> to vector<8xf32>
    %39 = vector.shape_cast %38 : vector<8xf32> to vector<8x1xf32>
    %40 = vector.broadcast %39 : vector<8x1xf32> to vector<8x16xf32>
    %41 = arith.subf %37, %40 : vector<8x16xf32>
    %42 = math.exp %41 : vector<8x16xf32>
    %cst_21 = arith.constant dense<0.000000e+00> : vector<8xf32>
    %43 = vector.multi_reduction <add>, %42, %cst_21 [1] : vector<8x16xf32> to vector<8xf32>
    %44 = vector.shape_cast %43 : vector<8xf32> to vector<8x1xf32>
    %45 = arith.truncf %42 : vector<8x16xf32> to vector<8x16xbf16>
    %c1_22 = arith.constant 1 : index
    %c0_23 = arith.constant 0 : index
    %c0_24 = arith.constant 0 : index
    %46 = vector.load %arg9[%c1_22, %c0_23, %c0_24] : memref<4x16x8xbf16, #tpu.memory_space<vmem>>, vector<1x16x8xbf16>
    %47 = vector.shape_cast %46 : vector<1x16x8xbf16> to vector<16x8xbf16>
    %cst_25 = arith.constant dense<0.000000e+00> : vector<8x8xf32>
    %48 = tpu.matmul %45, %47, %cst_25 {dimension_numbers = #tpu.dot_dimension_numbers<[1], [0], [0], [1], [0, 0, 1, 1], [], []>} : vector<8x16xbf16>, vector<16x8xbf16>, vector<8x8xf32> -> vector<8x8xf32>
    %49 = tpu.reciprocal %44 {approx = true} : vector<8x1xf32> -> vector<8x1xf32>
    %50 = vector.broadcast %49 : vector<8x1xf32> to vector<8x8xf32>
    %51 = arith.mulf %48, %50 : vector<8x8xf32>
    %52 = arith.truncf %51 : vector<8x8xf32> to vector<8x8xbf16>
    %c0_26 = arith.constant 0 : index
    %c8 = arith.constant 8 : index
    %53 = vector.load %arg10[%c0_26, %c8] : memref<8x32xbf16, #tpu.memory_space<vmem>>, vector<8x8xbf16>
    tpu.vector_store %arg10[%c0_26, %c8], %52 {strides = array<i32>} : memref<8x32xbf16, #tpu.memory_space<vmem>>, vector<8x8xbf16>,
    %54 = vector.extract_strided_slice %11 {offsets = [0, 16], sizes = [8, 8], strides = [1, 1]} : vector<8x32xf32> to vector<8x8xf32>
    %55 = arith.truncf %54 : vector<8x8xf32> to vector<8x8xbf16>
    %c2 = arith.constant 2 : index
    %c0_27 = arith.constant 0 : index
    %c0_28 = arith.constant 0 : index
    %56 = vector.load %arg8[%c2, %c0_27, %c0_28] : memref<4x8x16xbf16, #tpu.memory_space<vmem>>, vector<1x8x16xbf16>
    %57 = vector.shape_cast %56 : vector<1x8x16xbf16> to vector<8x16xbf16>
    %cst_29 = arith.constant dense<0.000000e+00> : vector<8x16xf32>
    %58 = tpu.matmul %55, %57, %cst_29 {dimension_numbers = #tpu.dot_dimension_numbers<[1], [0], [0], [1], [0, 0, 1, 1], [], []>} : vector<8x8xbf16>, vector<8x16xbf16>, vector<8x16xf32> -> vector<8x16xf32>
    %cst_30 = arith.constant dense<0xFF800000> : vector<8xf32>
    %59 = vector.multi_reduction <maximumf>, %58, %cst_30 [1] : vector<8x16xf32> to vector<8xf32>
    %60 = vector.shape_cast %59 : vector<8xf32> to vector<8x1xf32>
    %61 = vector.broadcast %60 : vector<8x1xf32> to vector<8x16xf32>
    %62 = arith.subf %58, %61 : vector<8x16xf32>
    %63 = math.exp %62 : vector<8x16xf32>
    %cst_31 = arith.constant dense<0.000000e+00> : vector<8xf32>
    %64 = vector.multi_reduction <add>, %63, %cst_31 [1] : vector<8x16xf32> to vector<8xf32>
    %65 = vector.shape_cast %64 : vector<8xf32> to vector<8x1xf32>
    %66 = arith.truncf %63 : vector<8x16xf32> to vector<8x16xbf16>
    %c2_32 = arith.constant 2 : index
    %c0_33 = arith.constant 0 : index
    %c0_34 = arith.constant 0 : index
    %67 = vector.load %arg9[%c2_32, %c0_33, %c0_34] : memref<4x16x8xbf16, #tpu.memory_space<vmem>>, vector<1x16x8xbf16>
    %68 = vector.shape_cast %67 : vector<1x16x8xbf16> to vector<16x8xbf16>
    %cst_35 = arith.constant dense<0.000000e+00> : vector<8x8xf32>
    %69 = tpu.matmul %66, %68, %cst_35 {dimension_numbers = #tpu.dot_dimension_numbers<[1], [0], [0], [1], [0, 0, 1, 1], [], []>} : vector<8x16xbf16>, vector<16x8xbf16>, vector<8x8xf32> -> vector<8x8xf32>
    %70 = tpu.reciprocal %65 {approx = true} : vector<8x1xf32> -> vector<8x1xf32>
    %71 = vector.broadcast %70 : vector<8x1xf32> to vector<8x8xf32>
    %72 = arith.mulf %69, %71 : vector<8x8xf32>
    %73 = arith.truncf %72 : vector<8x8xf32> to vector<8x8xbf16>
    %c0_36 = arith.constant 0 : index
    %c16 = arith.constant 16 : index
    %74 = vector.load %arg10[%c0_36, %c16] : memref<8x32xbf16, #tpu.memory_space<vmem>>, vector<8x8xbf16>
    tpu.vector_store %arg10[%c0_36, %c16], %73 {strides = array<i32>} : memref<8x32xbf16, #tpu.memory_space<vmem>>, vector<8x8xbf16>,
    %75 = vector.extract_strided_slice %11 {offsets = [0, 24], sizes = [8, 8], strides = [1, 1]} : vector<8x32xf32> to vector<8x8xf32>
    %76 = arith.truncf %75 : vector<8x8xf32> to vector<8x8xbf16>
    %c3 = arith.constant 3 : index
    %c0_37 = arith.constant 0 : index
    %c0_38 = arith.constant 0 : index
    %77 = vector.load %arg8[%c3, %c0_37, %c0_38] : memref<4x8x16xbf16, #tpu.memory_space<vmem>>, vector<1x8x16xbf16>
    %78 = vector.shape_cast %77 : vector<1x8x16xbf16> to vector<8x16xbf16>
    %cst_39 = arith.constant dense<0.000000e+00> : vector<8x16xf32>
    %79 = tpu.matmul %76, %78, %cst_39 {dimension_numbers = #tpu.dot_dimension_numbers<[1], [0], [0], [1], [0, 0, 1, 1], [], []>} : vector<8x8xbf16>, vector<8x16xbf16>, vector<8x16xf32> -> vector<8x16xf32>
    %cst_40 = arith.constant dense<0xFF800000> : vector<8xf32>
    %80 = vector.multi_reduction <maximumf>, %79, %cst_40 [1] : vector<8x16xf32> to vector<8xf32>
    %81 = vector.shape_cast %80 : vector<8xf32> to vector<8x1xf32>
    %82 = vector.broadcast %81 : vector<8x1xf32> to vector<8x16xf32>
    %83 = arith.subf %79, %82 : vector<8x16xf32>
    %84 = math.exp %83 : vector<8x16xf32>
    %cst_41 = arith.constant dense<0.000000e+00> : vector<8xf32>
    %85 = vector.multi_reduction <add>, %84, %cst_41 [1] : vector<8x16xf32> to vector<8xf32>
    %86 = vector.shape_cast %85 : vector<8xf32> to vector<8x1xf32>
    %87 = arith.truncf %84 : vector<8x16xf32> to vector<8x16xbf16>
    %c3_42 = arith.constant 3 : index
    %c0_43 = arith.constant 0 : index
    %c0_44 = arith.constant 0 : index
    %88 = vector.load %arg9[%c3_42, %c0_43, %c0_44] : memref<4x16x8xbf16, #tpu.memory_space<vmem>>, vector<1x16x8xbf16>
    %89 = vector.shape_cast %88 : vector<1x16x8xbf16> to vector<16x8xbf16>
    %cst_45 = arith.constant dense<0.000000e+00> : vector<8x8xf32>
    %90 = tpu.matmul %87, %89, %cst_45 {dimension_numbers = #tpu.dot_dimension_numbers<[1], [0], [0], [1], [0, 0, 1, 1], [], []>} : vector<8x16xbf16>, vector<16x8xbf16>, vector<8x8xf32> -> vector<8x8xf32>
    %91 = tpu.reciprocal %86 {approx = true} : vector<8x1xf32> -> vector<8x1xf32>
    %92 = vector.broadcast %91 : vector<8x1xf32> to vector<8x8xf32>
    %93 = arith.mulf %90, %92 : vector<8x8xf32>
    %94 = arith.truncf %93 : vector<8x8xf32> to vector<8x8xbf16>
    %c0_46 = arith.constant 0 : index
    %c24 = arith.constant 24 : index
    %95 = vector.load %arg10[%c0_46, %c24] : memref<8x32xbf16, #tpu.memory_space<vmem>>, vector<8x8xbf16>
    tpu.vector_store %arg10[%c0_46, %c24], %94 {strides = array<i32>} : memref<8x32xbf16, #tpu.memory_space<vmem>>, vector<8x8xbf16>,
    %c0_47 = arith.constant 0 : index
    %c0_48 = arith.constant 0 : index
    %96 = vector.load %arg10[%c0_47, %c0_48] : memref<8x32xbf16, #tpu.memory_space<vmem>>, vector<8x32xbf16>
    %c0_49 = arith.constant 0 : index
    %c0_50 = arith.constant 0 : index
    %97 = vector.load %arg5[%c0_49, %c0_50] : memref<32x32xbf16, #tpu.memory_space<vmem>>, vector<32x32xbf16>
    %cst_51 = arith.constant dense<0.000000e+00> : vector<8x32xf32>
    %98 = tpu.matmul %96, %97, %cst_51 {dimension_numbers = #tpu.dot_dimension_numbers<[1], [0], [0], [1], [0, 0, 1, 1], [], []>} : vector<8x32xbf16>, vector<32x32xbf16>, vector<8x32xf32> -> vector<8x32xf32>
    %c0_52 = arith.constant 0 : index
    %c0_53 = arith.constant 0 : index
    %99 = vector.load %arg6[%c0_52, %c0_53] : memref<1x32xf32, #tpu.memory_space<vmem>>, vector<1x32xf32>
    %100 = vector.broadcast %99 : vector<1x32xf32> to vector<8x32xf32>
    %101 = arith.addf %98, %100 : vector<8x32xf32>
    %c0_54 = arith.constant 0 : index
    %c0_55 = arith.constant 0 : index
    %c0_56 = arith.constant 0 : index
    %102 = vector.load %arg7[%c0_54, %c0_55, %c0_56] : memref<1x8x32xf32, #tpu.memory_space<vmem>>, vector<1x8x32xf32>
    %103 = vector.shape_cast %102 : vector<1x8x32xf32> to vector<8x32xf32>
    %104 = vector.shape_cast %101 : vector<8x32xf32> to vector<1x8x32xf32>
    tpu.vector_store %arg7[%c0_54, %c0_55, %c0_56], %104 {strides = array<i32>} : memref<1x8x32xf32, #tpu.memory_space<vmem>>, vector<1x8x32xf32>,
    return
  }
  func.func @transform_0(%arg0: i32, %arg1: i32) -> (i32, i32, i32) {
    %c0_i32 = arith.constant 0 : i32
    %c0_i32_0 = arith.constant 0 : i32
    %c0_i32_1 = arith.constant 0 : i32
    return %arg0, %c0_i32, %c0_i32_0 : i32, i32, i32
  }
  func.func @transform_1(%arg0: i32, %arg1: i32) -> (i32, i32) {
    %c0_i32 = arith.constant 0 : i32
    %c0_i32_0 = arith.constant 0 : i32
    %c0_i32_1 = arith.constant 0 : i32
    return %c0_i32, %c0_i32_0 : i32, i32
  }
  func.func @transform_2(%arg0: i32, %arg1: i32) -> (i32, i32) {
    %c0_i32 = arith.constant 0 : i32
    %c0_i32_0 = arith.constant 0 : i32
    %c0_i32_1 = arith.constant 0 : i32
    return %c0_i32, %c0_i32_0 : i32, i32
  }
  func.func @transform_3(%arg0: i32, %arg1: i32) -> (i32, i32) {
    %c0_i32 = arith.constant 0 : i32
    %c0_i32_0 = arith.constant 0 : i32
    %c0_i32_1 = arith.constant 0 : i32
    return %c0_i32, %c0_i32_0 : i32, i32
  }
  func.func @transform_4(%arg0: i32, %arg1: i32) -> (i32, i32) {
    %c0_i32 = arith.constant 0 : i32
    %c0_i32_0 = arith.constant 0 : i32
    %c0_i32_1 = arith.constant 0 : i32
    return %c0_i32, %c0_i32_0 : i32, i32
  }
  func.func @transform_5(%arg0: i32, %arg1: i32) -> (i32, i32, i32) {
    %c0_i32 = arith.constant 0 : i32
    %c0_i32_0 = arith.constant 0 : i32
    return %arg0, %arg1, %c0_i32 : i32, i32, i32
  }
}

</mosaic_0001>

<bundles_post_ra>
// kernel: tpu_custom_call.1
= control target key start
LH: loop header
LB: loop body
LE: loop exit
PB: predicated region body
PF: predicated region fallthrough
CT: control target
= control target key end

     0   :  { %6 = vsyncpa [#allocation3], 0  ;;  %s114_s0 = inlined_call_operand.hbm [shape: f32[8,128], index: 0, kind: input, shape index: {}]   ;;  %s115_s1 = inlined_call_operand.hbm [shape: f32[8,128], index: 1, kind: output, shape index: {}]  }
   0x1   :  { %7 = vsyncpa [#allocation4], 0  ;;  %s13_s8 = sshll.u32 %s114_s0, 4  ;;  %s96_s9 = smov [#allocation2]   ;;  %s14_s8 = int_to_ptr.hbm [resolvable:$true] %s13_s8 }
   0x2   :  { %s15_s10 = sshll.u32 %s96_s9, 4  ;;  %s16_s10 = int_to_ptr.vmem [resolvable:$true] %s15_s10 }
   0x3   :  { %18 = dma.hbm_to_vmem [thread:$0]  %s14_s8, 128, %s16_s10, [#allocation3]  }
   0x4   :  { %92 = dma.done.wait [#allocation3], 128  }
   0x5   :  { %93 = vsyncadd [#allocation3], 4294967168  ;;  %s97_s11 = smov [#allocation5]   ;;  %s32_s15 = sshll.u32 %s115_s1, 4  ;;  %v23_v0 = vld [vmem:[#allocation2] sm:$0xff]  ;;  %s33_s15 = int_to_ptr.hbm [resolvable:$true] %s32_s15 }
   0x6   :  { %s30_s12 = sshll.u32 %s97_s11, 4  ;;  %24 = vst [vmem:[#allocation5] sm:$0xff] %v23_v0  ;;  %s31_s12 = int_to_ptr.vmem [resolvable:$true] %s30_s12 }
   0x7   :  { %35 = dma.vmem_to_hbm [thread:$0]  %s31_s12, 128, %s33_s15, [#allocation4]  }
   0x8   :  { %94 = dma.done.wait [#allocation4], 128  }
   0x9   :  { %95 = vsyncadd [#allocation4], 4294967168 }
   0xa   :  { %40 = vsyncpa [#allocation3], 1 }
   0xb   :  { %41 = vsyncpa [#allocation4], 1 }

// kernel: tpu_custom_call.1
= control target key start
LH: loop header
LB: loop body
LE: loop exit
PB: predicated region body
PF: predicated region fallthrough
CT: control target
= control target key end

     0   :  { %s1881_s0 = inlined_call_operand.hbm [shape: bf16[2,16,32], index: 0, kind: input, shape index: {}]   ;;  %s1882_s1 = inlined_call_operand.hbm [shape: bf16[32,32], index: 1, kind: input, shape index: {}]   ;;  %s1883_s2 = inlined_call_operand.hbm [shape: bf16[32,64], index: 2, kind: input, shape index: {}]   ;;  %s1884_s3 = inlined_call_operand.hbm [shape: bf16[32,32], index: 3, kind: input, shape index: {}]   ;;  %s1885_s4 = inlined_call_operand.vmem [shape: f32[1,32], index: 4, kind: input, shape index: {}]   ;;  %s1886_s5 = inlined_call_operand.hbm [shape: f32[2,16,32], index: 5, kind: output, shape index: {}]  }
   0x1   :  { %1895 = sst [smem:[#allocation23_spill]] %s1882_s1 }
   0x2   :  { %1896 = sst [smem:[#allocation24_spill]] %s1883_s2 }
   0x3   :  { %1897 = sst [smem:[#allocation25_spill]] %s1884_s3 }
   0x4   :  { %1898 = sst [smem:[#allocation26_spill]] %s1885_s4 }
   0x5   :  { %1899 = sst [smem:[#allocation27_spill]] %s1886_s5 }
   0x6   :  { %10 = vsyncpa [#allocation6], 0 }
   0x7   :  { %12 = vsyncpa [#allocation6 + $0x1], 0 }
   0x8   :  { %13 = vsyncpa [#allocation9], 0 }
   0x9   :  { %14 = vsyncpa [#allocation12], 0 }
   0xa   :  { %15 = vsyncpa [#allocation7], 0 }
   0xb   :  { %17 = vsyncpa [#allocation7 + $0x1], 0  ;;  %s1602_s18 = smov 0   ;;  %s1604_s19 = smov 0  }
   0xc   :  { %s1606_s20 = smov 0   ;;  %s1608_s21 = smov 0  }
   0xd   :  { %s1610_s22 = smov 0   ;;  %s1612_s23 = smov 0  }
   0xe   :  { %s1614_s24 = smov 0   ;;  %s1616_s25 = smov 0  }
   0xf   :  { %s1618_s26 = smov 0   ;;  %s1620_s27 = smov 0  }
  0x10   :  { %s1622_s28 = smov 0  }
  0x11 LB: > { %1900 = sst [smem:[#allocation18_spill]] %s1512_s18  ;;  %s1030_s29 = sadd.s32 4294967295, %s1552_s28   ;;  %s1552_s28 = sphi %s1622_s28, %s23_s28   ;;  %s1548_s27 = sphi %s1620_s27, %s1931_s27   ;;  %s1544_s26 = sphi %s1618_s26, %s1922_s26   ;;  %s1540_s25 = sphi %s1616_s25, %s1930_s25   ;;  %s1536_s24 = sphi %s1614_s24, %s1921_s24   ;;  %s1532_s23 = sphi %s1612_s23, %s1929_s23   ;;  %s1528_s22 = sphi %s1610_s22, %s1928_s22   ;;  %s1524_s21 = sphi %s1608_s21, %s1927_s21   ;;  %s1520_s20 = sphi %s1606_s20, %s1926_s20   ;;  %s1516_s19 = sphi %s1604_s19, %s1925_s19   ;;  %s1512_s18 = sphi %s1602_s18, %s1924_s18  }
  0x12   : > { %1901 = sst [smem:[#allocation19_spill]] %s1544_s26  ;;  %s1031_s30 = sadd.s32 4294967294, %s1552_s28  }
  0x13   : > { %p55_p0 = scmp.ne.s32.totalorder %s1528_s22, %s1524_s21  ;;  %p1658_p1 = scmp.eq.s32.totalorder %s1030_s29, 0 }
  0x14   : > { %p164_p2 = scmp.ne.s32.totalorder %s1520_s20, %s1516_s19  ;;  %p165_p3 = scmp.eq.s32.totalorder %s1030_s29, 3 }
  0x15   : > { %p1666_p4 = por %p1658_p1, %p55_p0  ;;  %p170_p5 = scmp.ne.s32.totalorder %s1516_s19, %s1512_s18 }
  0x16   : > { %p1672_p6 = por %p165_p3, %p164_p2  ;;  %p171_p7 = scmp.eq.s32.totalorder %s1031_s30, 3 }
  0x17   : > { %p1032_p8 = scmp.ge.s32.totalorder %s1552_s28, 1  ;;  %p178_p9 = scmp.lt.s32.totalorder %s1552_s28, 5 }
  0x18   : > { %p1678_p10 = por %p171_p7, %p170_p5  ;;  %s1908_s1 = sld [smem:[#allocation23_spill]] }
  0x19   : > { %p1682_p11 = pnand %p1032_p8, %p178_p9  ;;  %s1554_s14 = smov [#allocation8]  }
  0x1a   : > { %s1905_s9 = scalar_select %p1678_p10, 1, 0 }
  0x1b   : > { %p1137_p12 = pneg %p1682_p11  ;;  %s191_s15 = sshll.u32 %s1554_s14, 4  ;;  %s192_s15 = int_to_ptr.vmem [resolvable:$true] %s191_s15 }
  0x1c   : > { %1906 = sst [smem:[#allocation20_spill]] %s1905_s9  ;;  %s1887_s30 = smov 64  }
  0x1d   : > { %p1693_p13 = pnand %p1137_p12, %p1658_p1  ;;  %s1910_s2 = sld [smem:[#allocation24_spill]] }
  0x1e   : > { %s189_s13 = sshll.u32 %s1908_s1, 4  ;;  %s1888_s11 = smov 4   ;;  %s190_s13 = int_to_ptr.hbm [resolvable:$true] %s189_s13 }
  0x1f   : > { %1140 = dma.hbm_to_vmem [thread:$0]  (!%p1693_p13), %s190_s13, 256, %s192_s15, [#allocation9], %s1887_s30, %s1887_s30, %s1888_s11  }
  0x20   : > { %s1911_s3 = sld [smem:[#allocation25_spill]]  ;;  %s1557_s21 = smov [#allocation10]  }
  0x21   : > { %s205_s1 = sshll.u32 %s1557_s21, 4  ;;  %s32_s15 = sadd.s32 1, %s1544_s26  ;;  %s206_s1 = int_to_ptr.vmem [resolvable:$true] %s205_s1 }
  0x22   : > { %s35_s12 = sadd.s32 1, %s1548_s27  ;;  %p33_p0 = scmp.ge.s32.totalorder %s32_s15, 2 }
  0x23   : > { %s203_s29 = sshll.u32 %s1910_s2, 4  ;;  %s1558_s2 = smov [#allocation11]   ;;  %s204_s29 = int_to_ptr.hbm [resolvable:$true] %s203_s29 }
  0x24   : > { %1143 = dma.hbm_to_vmem [thread:$0]  (!%p1693_p13), %s204_s29, 256, %s206_s1, [#allocation9], %s1887_s30, %s1887_s30, %s1888_s11  }
  0x25   : > { %s219_s13 = sshll.u32 %s1558_s2, 4  ;;  %s42_s14 = sadd.s32 1, %s1532_s23  ;;  %s220_s13 = int_to_ptr.vmem [resolvable:$true] %s219_s13 }
  0x26   : > { %s217_s17 = sshll.u32 %s1911_s3, 4  ;;  %p49_p2 = scmp.ne.s32.totalorder %s1532_s23, %s1528_s22  ;;  %s218_s17 = int_to_ptr.hbm [resolvable:$true] %s217_s17 }
  0x27   : > { %1146 = dma.hbm_to_vmem [thread:$0]  (!%p1693_p13), %s218_s17, 256, %s220_s13, [#allocation12], %s1887_s30, %s1887_s30, %s1888_s11  }
  0x28   : > { %p50_p3 = scmp.eq.s32.totalorder %s1552_s28, 0  ;;  %s1933_s15 = smov (%p33_p0, %s32_s15), 0 }
  0x29   : > { %1912 = sst [smem:[#allocation21_spill]] %s1933_s15  ;;  %s1935_s12 = smov (!%p33_p0, %s35_s12), %s1548_s27 }
  0x2a   : > { %p1727_p5 = por %p50_p3, %p49_p2  ;;  %s150_s2 = ssub.s32 %s1544_s26, %s1933_s15 }
  0x2b   : > { %p37_p7 = scmp.ge.s32.totalorder %s1935_s12, 2  ;;  %s154_s16 = sadd.s32 1, %s1520_s20 }
  0x2c   : > { %p1158_p8 = scmp.lt.s32.totalorder %s1552_s28, 4  ;;  %s236_s29 = sand.u32 1, %s1532_s23  }
  0x2d   : > { %s1937_s12 = smov (%p37_p7, %s1935_s12), 0  ;;  %s1037_s17 = sshll.u32 %s236_s29, 3 }
  0x2e   : > { %1914 = sst [smem:[#allocation22_spill]] %s1937_s12  ;;  %s39_s21 = ssub.s32 %s1548_s27, %s1937_s12 }
  0x2f   : > { %p40_p9 = scmp.eq.s32.totalorder %s39_s21, 0  ;;  %s151_s13 = sor.u32 %s150_s2, %s39_s21 }
  0x30   : > { %p152_p12 = scmp.eq.s32.totalorder %s151_s13, 0  ;;  %s1109_s30 = sshll.u32 %s1548_s27, 3 }
  0x31   : > { %s1742_s11 = scalar_select %p40_p9, %s1532_s23, %s42_s14  }
  0x32   : > { %s1745_s3 = scalar_select %p152_p12, %s1520_s20, %s154_s16  }
  0x33   : > { %s245_s9 = scalar_lea.hbm %s1881_s0, %s1109_s30  ;;  %s240_s18 = scalar_lea.vmem [#allocation5], %s1037_s17 }
  0x34   : > { %s248_s4 = sshll.u32 %s240_s18, 4  ;;  %s246_s5 = sshll.u32 %s245_s9, 4  ;;  %s249_s4 = int_to_ptr.vmem [resolvable:$true] %s248_s4  ;;  %s247_s5 = int_to_ptr.hbm [resolvable:$true] %s246_s5 }
  0x35   : > { %p1148_p13 = pnand %p1158_p8, %p1727_p5  ;;  %s237_s12 = scalar_lea.sflag [#allocation6], %s236_s29 }
  0x36   : > { %s1915_s2 = smov 4   ;;  %s1916_s21 = smov 64  }
  0x37   : > { %1150 = dma.hbm_to_vmem [thread:$0]  (!%p1148_p13), %s247_s5, 128, %s249_s4, %s237_s12, %s1916_s21, %s1916_s21, %s1915_s2  }
  0x38   : > { %260 = sbr.rel (%p1682_p11) target bundleno = 1621 (0x655), region = 40  ;;  %s262_s26 = sand.u32 (!%p1682_p11), 1, %s1528_s22  }
  0x39   : > { %s1760_s30 = sshll.u32 (!%p1682_p11), %s262_s26, 3  ;;  %s263_s18 = scalar_lea.sflag (!%p1682_p11), [#allocation6], %s262_s26 }
  0x3a   : > { %s266_s9 = scalar_lea.vmem (!%p1682_p11), [#allocation5], %s1760_s30 }
  0x3d   : > { %1495 = dma.done.wait (%p1666_p4), %s263_s18, 128  }
  0x3e   : > { %1497 = vsyncadd (%p1666_p4), %s263_s18, 4294967168 }
  0x3f   : > { %1499 = dma.done.wait (%p1658_p1), [#allocation9], 512  }
  0x40   : > { %1501 = vsyncadd (%p1658_p1), [#allocation9], 4294966784 }
  0x41   : > { %1503 = dma.done.wait (%p1658_p1), [#allocation12], 256  }
  0x42   : > { %1505 = vsyncadd (%p1658_p1), [#allocation12], 4294967040  ;;  %s306_s4 = sand.u32 1, %s1516_s19   ;;  %p1046_p4 = scmp.ne.s32.totalorder %s1536_s24, 0 }
  0x43   : > { %s1778_s5 = sshll.u32 %s306_s4, 3  ;;  %s1559_s6 = smov (!%p1046_p4), 80  }
  0x44   : > { %s308_s7 = scalar_lea.vmem [#allocation13], %s1778_s5  ;;  %313 = sbr.rel (%p1046_p4) target bundleno = 549 (0x225), region = 60 }
  0x45   : > { %s1560_s10 = smov (!%p1046_p4), 88   ;;  %s1561_s15 = smov (!%p1046_p4), 96  }
  0x46   : > { %s1562_s12 = smov (!%p1046_p4), 104   ;;  %s1563_s14 = smov (!%p1046_p4), 120  }
  0x47   : > { %s1564_s1 = smov (!%p1046_p4), 112   ;;  %s1565_s16 = smov (!%p1046_p4), 72  }
  0x49   : > { %v1112_v0 = vld [vmem:[#allocation10 + $0x8] sm:$0xff]  ;;  %v1111_v1 = vld [vmem:[#allocation10] sm:$0xff]  ;;  %vm337_vm0 = vcmask 261120   ;;  %vm400_vm1 = vcmask 60416   ;;  %vm388_vm2 = vcmask 125952  }
  0x4a   : > { %347 = vmatpush.bf16.msra.mxu0 %v1112_v0  ;;  %v1110_v2 = vld [vmem:[%s266_s9] sm:$0xff] }
  0x4e   : > { %348 = vmatpush.bf16.msra.mxu0 %v1111_v1 }
  0x51   : > { %1059 = vmatmul.msk.bf16.vlgmr.msra.gmra.mxu0 %vm337_vm0, %v1110_v2 }
  0xce   : > { %v350_v3 = vpop.f32.mrf.mxu0 }
  0xcf   : > { %v390_v4 = vpack.c.bf16 %v350_v3, %v350_v3 }
  0xd1   : > { %496 = vrot.lane.b32.xlu2 %v390_v4, %s1559_s6  ;;  %446 = vrot.lane.b32.xlu0 %v390_v4, %s1560_s10 }
  0xd2   : > { %394 = vrot.lane.b32.xlu1 %v390_v4, %s1561_s15 }
  0xd6   : > { %v352_v5 = vpop.f32.mrf.mxu0 }
  0xd7   : > { %v1280_v6 = vpack.i.bf16 %v352_v5, %v350_v3  ;;  %v391_v7 = vpack.c.bf16 %v352_v5, %v352_v5 }
  0xd9   : > { %1281 = vrot.lane.b32.xlu0 %v1280_v6, %s1562_s12  ;;  %1271 = vrot.lane.b32.xlu2 %v1280_v6, %s1563_s14 }
  0xda   : > { %1276 = vrot.lane.b32.xlu1 %v1280_v6, %s1564_s1 }
  0xe2   : > { %396 = vrot.lane.b32.xlu1 %v391_v7, %s1561_s15 }
  0xea   : > { %448 = vrot.lane.b32.xlu1 %v391_v7, %s1560_s10 }
  0xfb   : > { %355 = vxpose.xlu0.b32.start [1/2] (short) (narrow) %v350_v3, 8 }
 0x103   : > { %356 = vxpose.xlu0.b32.end [2/2] (short) (narrow) %v352_v5, 8 }
 0x12b   : > { %v497_v8 = vpop.permute.xlu2 %496 }
 0x12c   : > { %503 = vst.msk [vmem:[#allocation3 + $0x10] sm:$0xf] %vm400_vm1, %v497_v8 }
 0x133   : > { %v1272_v9 = vpop.permute.xlu2 %1271 }
 0x134   : > { %v1273_v10 = vunpack.i.l.bf16 %v1272_v9  ;;  %v1274_v11 = vunpack.i.h.bf16 %v1272_v9 }
 0x136   : > { %411 = vxpose.xlu2.b32.start [1/2] (short) (narrow) %v1273_v10, 8 }
 0x13e   : > { %412 = vxpose.xlu2.b32.end [2/2] (short) (narrow) %v1274_v11, 8 }
 0x143   : > { %v447_v12 = vpop.permute.xlu0 %446 }
 0x144   : > { %453 = vst.msk [vmem:[#allocation3 + $0x8] sm:$0xf] %vm400_vm1, %v447_v12  ;;  %v395_v13 = vpop.permute.xlu1 %394 }
 0x145   : > { %401 = vst.msk [vmem:[#allocation3] sm:$0xf] %vm400_vm1, %v395_v13 }
 0x14b   : > { %v1282_v14 = vpop.permute.xlu0 %1281 }
 0x14c   : > { %v1277_v15 = vpop.permute.xlu1 %1276  ;;  %v1283_v16 = vunpack.i.l.bf16 %v1282_v14  ;;  %v1284_v18 = vunpack.i.h.bf16 %v1282_v14 }
 0x14d   : > { %v1278_v17 = vunpack.i.l.bf16 %v1277_v15  ;;  %v1279_v20 = vunpack.i.h.bf16 %v1277_v15 }
 0x14e   : > { %511 = vxpose.xlu0.b32.start [1/2] (short) (narrow) %v1283_v16, 8 }
 0x14f   : > { %461 = vxpose.xlu1.b32.start [1/2] (short) (narrow) %v1278_v17, 8 }
 0x154   : > { %v397_v19 = vpop.permute.xlu1 %396 }
 0x155   : > { %402 = vst.msk [vmem:[#allocation3 + $0x4] sm:$0xf] %vm400_vm1, %v397_v19 }
 0x156   : > { %512 = vxpose.xlu0.b32.end [2/2] (short) (narrow) %v1284_v18, 8 }
 0x157   : > { %462 = vxpose.xlu1.b32.end [2/2] (short) (narrow) %v1279_v20, 8 }
 0x15c   : > { %v449_v21 = vpop.permute.xlu1 %448 }
 0x15d   : > { %454 = vst.msk [vmem:[#allocation3 + $0xc] sm:$0xf] %vm400_vm1, %v449_v21 }
 0x19f   : > { %v371_v24 = vpop.trf.xlu0 }
 0x1a0   : > { %v387_v25 = vpack.c.bf16 %v371_v24, %v371_v24 }
 0x1a2   : > { %389 = vst.msk [vmem:[#allocation2] sm:$0xf] %vm388_vm2, %v387_v25 }
 0x1a7   : > { %546 = vrot.lane.b32.xlu2 %v390_v4, %s1565_s16 }
 0x1af   : > { %548 = vrot.lane.b32.xlu2 %v391_v7, %s1565_s16 }
 0x1b1   : > { %498 = vrot.lane.b32.xlu1 %v391_v7, %s1559_s6 }
 0x1cf   : > { %v427_v22 = vpop.trf.xlu2 }
 0x1d0   : > { %v443_v23 = vpack.c.bf16 %v427_v22, %v427_v22 }
 0x1d2   : > { %445 = vst.msk [vmem:[#allocation2 + $0x4] sm:$0xf] %vm388_vm2, %v443_v23 }
 0x1f2   : > { %v527_v26 = vpop.trf.xlu0 }
 0x1f3   : > { %v477_v27 = vpop.trf.xlu1  ;;  %v543_v28 = vpack.c.bf16 %v527_v26, %v527_v26 }
 0x1f4   : > { %v493_v29 = vpack.c.bf16 %v477_v27, %v477_v27 }
 0x1f5   : > { %545 = vst.msk [vmem:[#allocation2 + $0xc] sm:$0xf] %vm388_vm2, %v543_v28 }
 0x1f6   : > { %495 = vst.msk [vmem:[#allocation2 + $0x8] sm:$0xf] %vm388_vm2, %v493_v29 }
 0x201   : > { %v547_v30 = vpop.permute.xlu2 %546 }
 0x202   : > { %553 = vst.msk [vmem:[#allocation3 + $0x18] sm:$0xf] %vm400_vm1, %v547_v30 }
 0x209   : > { %v549_v31 = vpop.permute.xlu2 %548 }
 0x20a   : > { %554 = vst.msk [vmem:[#allocation3 + $0x1c] sm:$0xf] %vm400_vm1, %v549_v31 }
 0x223   : > { %v499_v32 = vpop.permute.xlu1 %498 }
 0x224   : > { %504 = vst.msk [vmem:[#allocation3 + $0x14] sm:$0xf] %vm400_vm1, %v499_v32 }
 0x225 PF: > { %v1114_v33 = vld [vmem:[#allocation8 + $0x8] sm:$0xff]  ;;  %s1060_s29 = sshll.u32 %s1536_s24, 3  ;;  %v1113_v34 = vld [vmem:[#allocation8] sm:$0xff]  ;;  %vm577_vm3 = vcmask 261120   ;;  %v596_v36 = vld [vmem:[#allocation2] sm:$0xf] }
 0x226   : > { %s556_s17 = sshra.s32 %s1060_s29, 3  ;;  %587 = vmatpush.bf16.msra.mxu0 %v1114_v33  ;;  %vm601_vm4 = vcmask 1043456   ;;  %vm597_vm5 = vcmask 64512   ;;  %s1566_s21 = smov 112   ;;  %v794_v42 = vld [vmem:[#allocation2 + $0xc] sm:$0xf] }
 0x227   : > { %s1061_s13 = sshll.u32 %s556_s17, 2  ;;  %v603_v37 = vsel %vm601_vm4, %v596_v36, 0  ;;  %s1567_s26 = smov 104   ;;  %v801_v43 = vsel %vm601_vm4, %v794_v42, 0  ;;  %vm618_vm6 = vcmask 130048   ;;  %v1115_v49 = vld [vmem:[#allocation3] sm:$0xff] }
 0x228   : > { %s559_s2 = scalar_lea.vmem %s266_s9, %s1061_s13 [#allocation5]  ;;  %612 = vmatpush.bf16.msra.mxu1 %v603_v37  ;;  %s1568_s30 = smov 120   ;;  %647 = vmatpush.bf16.msra.mxu2 %v1115_v49  ;;  %v727_v50 = vld [vmem:[#allocation2 + $0x8] sm:$0xf]  ;;  %v659_v51 = vld [vmem:[#allocation2 + $0x4] sm:$0xf]  ;;  %v1116_v13 = vld [vmem:[#allocation3 + $0x8] sm:$0xff] }
 0x229   : > { %v560_v35 = vld [vmem:[%s559_s2] sm:$0xf]  ;;  %v734_v52 = vsel %vm601_vm4, %v727_v50, 0  ;;  %v667_v53 = vsel %vm601_vm4, %v659_v51, 0  ;;  %v1118_v14 = vld [vmem:[#allocation3 + $0x18] sm:$0xff]  ;;  %s1569_s18 = smov 8  }
 0x22a   : > { %588 = vmatpush.bf16.msra.mxu0 %v1113_v34  ;;  %676 = vmatpush.bf16.msra.mxu3 %v667_v53  ;;  %vm656_vm7 = vcmask 60416   ;;  %s1570_s9 = smov 16   ;;  %s1571_s6 = smov 24   ;;  %v1120_v51 = vld [vmem:[#allocation11 + $0x8] sm:$0xff]  ;;  %vm724_vm8 = vcmask 126016   ;;  %v1119_v53 = vld [vmem:[#allocation11] sm:$0xff] }
 0x22b   : > { %v1117_v12 = vld [vmem:[#allocation3 + $0x10] sm:$0xff]  ;;  %vm791_vm9 = vcmask 191616   ;;  %vm858_vm10 = vcmask 257216   ;;  %s1105_s10 = sshll.u32 %s1540_s25, 1  ;;  %s1917_s16 = sld [smem:[#allocation27_spill]] }
 0x22c   : > { %743 = vmatpush.bf16.msrb.mxu2 %v734_v52  ;;  %711 = vmatpush.bf16.msrb.mxu1 %v1116_v13  ;;  %s909_s15 = sadd.s32 %s1536_s24, %s1105_s10  ;;  %s1918_s2 = sld [smem:[#allocation26_spill]] }
 0x22d   : > { %1070 = vmatmul.msk.bf16.vlgmr.msra.gmra.mxu0 %vm577_vm3, %v560_v35  ;;  %s1106_s12 = sshll.u32 %s909_s15, 3  ;;  %s899_s24 = scalar_lea.sflag [#allocation7], %s306_s4 }
 0x22e   : > { %810 = vmatpush.bf16.msrb.mxu0 %v801_v43  ;;  %778 = vmatpush.bf16.msrb.mxu3 %v1117_v12 }
 0x231   : > { %s911_s29 = scalar_lea.hbm %s1917_s16, %s1106_s12 }
 0x2aa   : > { %v590_v38 = vpop.f32.mrf.mxu0 }
 0x2ab   : > { %v594_v39 = vmul.f32 0.35355338, %v590_v38 }
 0x2ad   : > { %v595_v40 = vpack.c.bf16 %v594_v39, %v594_v39 }
 0x2af   : > { %728 = vrot.lane.b32.xlu1 %v595_v40, %s1566_s21  ;;  %1071 = vmatmul.msk.bf16.vlgmr.msra.gmra.mxu1 %vm597_vm5, %v595_v40  ;;  %s913_s21 = sshll.u32 %s308_s7, 4  ;;  %s914_s21 = int_to_ptr.vmem [resolvable:$true] %s913_s21 }
 0x2b0   : > { %845 = vmatpush.bf16.msra.mxu1 %v1118_v14 }
 0x2b2   : > { %v592_v41 = vpop.f32.mrf.mxu0 }
 0x2b7   : > { %795 = vrot.lane.b32.xlu1 %v595_v40, %s1567_s26  ;;  %s915_s26 = sshll.u32 %s911_s29, 4  ;;  %s916_s26 = int_to_ptr.hbm [resolvable:$true] %s915_s26 }
 0x2b8   : > { %s1436_s25 = sshra.s32 %s916_s26, 4  ;;  %s1437_s25 = int_to_ptr.hbm [resolvable:$true] %s1436_s25 }
 0x2b9   : > { %p1443_p2 = scmp.lt.s32.totalorder %s1437_s25, %s1917_s16 }
 0x321   : > { %v729_v44 = vpop.permute.xlu1 %728 }
 0x329   : > { %v796_v45 = vpop.permute.xlu1 %795 }
 0x32a   : > { %1089 = vmatmul.msk.bf16.vlgmr.msrb.gmra.mxu0 %vm597_vm5, %v796_v45 }
 0x32c   : > { %v614_v46 = vpop.f32.mrf.mxu1 }
 0x32d   : > { %v619_v47 = vsel %vm618_vm6, %v614_v46, -inf }
 0x32e   : > { %620 = vmax.xlane.f32.xlu0 %v619_v47 }
 0x334   : > { %v616_v48 = vpop.f32.mrf.mxu1 }
 0x342   : > { %661 = vrot.lane.b32.xlu0 %v595_v40, %s1568_s30  ;;  %s1438_s30 = scalar_lea.hbm %s1437_s25, 8 }
 0x343   : > { %p1439_p1 = scmp.ne.s32.totalorder %s1437_s25, %s1438_s30 }
 0x345   : > { %p1440_p11 = pnand %p1439_p1, %p1672_p6 }
 0x347   : > { %p1441_p0 = pneg %p1440_p11 }
 0x3a1   : > { %v621_v54 = vpop.xlane.xlu0 %620 }
 0x3a2   : > { %v622_v55 = vsub.f32 %v614_v46, %v621_v54 }
 0x3a4   : > { %v623_v56 = vmul.f32 1.442695, %v622_v55 }
 0x3a6   : > { %1286 = vpow2.f32 %v623_v56 }
 0x3a7   : > { %v812_v57 = vpop.f32.mrf.mxu0 }
 0x3a8   : > { %v816_v58 = vsel %vm618_vm6, %v812_v57, -inf }
 0x3a9   : > { %817 = vmax.xlane.f32.xlu1 %v816_v58 }
 0x3ac   : > { %v1287_v59 = vpop.eup %1286 }
 0x3ad   : > { %v628_v60 = vpack.c.bf16 %v1287_v59, %v1287_v59  ;;  %v625_v28 = vsel %vm618_vm6, %v1287_v59, 0.0 }
 0x3af   : > { %1076 = vmatmul.msk.bf16.vlgmr.msra.gmra.mxu2 %vm618_vm6, %v628_v60  ;;  %v814_v61 = vpop.f32.mrf.mxu0 }
 0x3b0   : > { %890 = vmatpush.bf16.msra.mxu2 %v1120_v51 }
 0x3b4   : > { %v662_v62 = vpop.permute.xlu0 %661  ;;  %891 = vmatpush.bf16.msra.mxu2 %v1119_v53 }
 0x3b5   : > { %1077 = vmatmul.msk.bf16.vlgmr.msra.gmra.mxu3 %vm597_vm5, %v662_v62 }
 0x3bf   : > { %1083 = vmatmul.msk.bf16.vlgmr.msrb.gmra.mxu2 %vm597_vm5, %v729_v44 }
 0x41c   : > { %v818_v63 = vpop.xlane.xlu1 %817 }
 0x41d   : > { %v819_v0 = vsub.f32 %v812_v57, %v818_v63  ;;  %v1285_v57 = vld [vmem:[%s1918_s2] ss:$0 sm:$0xff] }
 0x41f   : > { %v820_v1 = vmul.f32 1.442695, %v819_v0 }
 0x421   : > { %1288 = vpow2.f32 %v820_v1 }
 0x427   : > { %v1289_v2 = vpop.eup %1288 }
 0x428   : > { %v822_v3 = vsel %vm618_vm6, %v1289_v2, 0.0  ;;  %v825_v27 = vpack.c.bf16 %v1289_v2, %v1289_v2 }
 0x429   : > { %823 = vadd.xlane.f32.xlu0 %v822_v3 }
 0x432   : > { %v649_v4 = vpop.f32.mrf.mxu2 }
 0x438   : > { %v678_v5 = vpop.f32.mrf.mxu3 }
 0x439   : > { %v682_v6 = vsel %vm618_vm6, %v678_v5, -inf }
 0x43a   : > { %v651_v7 = vpop.f32.mrf.mxu2  ;;  %683 = vmax.xlane.f32.xlu2 %v682_v6 }
 0x440   : > { %v680_v8 = vpop.f32.mrf.mxu3 }
 0x442   : > { %v745_v9 = vpop.f32.mrf.mxu2 }
 0x443   : > { %v749_v10 = vsel %vm618_vm6, %v745_v9, -inf }
 0x444   : > { %750 = vmax.xlane.f32.xlu2 %v749_v10 }
 0x44a   : > { %v747_v11 = vpop.f32.mrf.mxu2 }
 0x49c   : > { %v824_v35 = vpop.xlane.xlu0 %823 }
 0x4ad   : > { %v684_v15 = vpop.xlane.xlu2 %683 }
 0x4ae   : > { %v685_v16 = vsub.f32 %v678_v5, %v684_v15 }
 0x4b0   : > { %v686_v17 = vmul.f32 1.442695, %v685_v16 }
 0x4b2   : > { %1290 = vpow2.f32 %v686_v17 }
 0x4b7   : > { %v751_v18 = vpop.xlane.xlu2 %750 }
 0x4b8   : > { %v1291_v19 = vpop.eup %1290  ;;  %v752_v20 = vsub.f32 %v745_v9, %v751_v18 }
 0x4b9   : > { %v688_v21 = vsel %vm618_vm6, %v1291_v19, 0.0  ;;  %v691_v22 = vpack.c.bf16 %v1291_v19, %v1291_v19 }
 0x4ba   : > { %v753_v23 = vmul.f32 1.442695, %v752_v20  ;;  %689 = vadd.xlane.f32.xlu2 %v688_v21 }
 0x4bb   : > { %1082 = vmatmul.msk.bf16.vlgmr.msrb.gmra.mxu1 %vm618_vm6, %v691_v22 }
 0x4bc   : > { %1292 = vpow2.f32 %v753_v23 }
 0x4c2   : > { %v1293_v24 = vpop.eup %1292 }
 0x4c3   : > { %v755_v25 = vsel %vm618_vm6, %v1293_v24, 0.0  ;;  %v758_v26 = vpack.c.bf16 %v1293_v24, %v1293_v24 }
 0x4c4   : > { %756 = vadd.xlane.f32.xlu2 %v755_v25 }
 0x4c5   : > { %1088 = vmatmul.msk.bf16.vlgmr.msrb.gmra.mxu3 %vm618_vm6, %v758_v26 }
 0x4cb   : > { %1094 = vmatmul.msk.bf16.vlgmr.msra.gmra.mxu1 %vm618_vm6, %v825_v27 }
 0x4cc   : > { %626 = vadd.xlane.f32.xlu2 %v625_v28 }
 0x52d   : > { %v690_v29 = vpop.xlane.xlu2 %689 }
 0x52e   : > { %1294 = vrcp.f32 %v690_v29 }
 0x534   : > { %v1295_v31 = vpop.eup %1294 }
 0x537   : > { %v757_v30 = vpop.xlane.xlu2 %756 }
 0x538   : > { %v713_v32 = vpop.f32.mrf.mxu1 }
 0x539   : > { %v718_v33 = vmul.f32 %v1295_v31, %v713_v32 }
 0x53b   : > { %v719_v34 = vpack.c.bf16 %v718_v33, %v718_v33 }
 0x53d   : > { %721 = vrot.lane.b32.xlu2 %v719_v34, %s1569_s18 }
 0x53f   : > { %v627_v36 = vpop.xlane.xlu2 %626 }
 0x540   : > { %1296 = vrcp.f32 %v627_v36  ;;  %v715_v37 = vpop.f32.mrf.mxu1 }
 0x541   : > { %1298 = vrcp.f32 %v824_v35 }
 0x542   : > { %1300 = vrcp.f32 %v757_v30 }
 0x546   : > { %v1297_v38 = vpop.eup %1296 }
 0x547   : > { %v1299_v39 = vpop.eup %1298  ;;  %v654_v40 = vmul.f32 %v1297_v38, %v649_v4 }
 0x548   : > { %v1301_v41 = vpop.eup %1300  ;;  %v780_v42 = vpop.f32.mrf.mxu3 }
 0x549   : > { %v847_v43 = vpop.f32.mrf.mxu1  ;;  %v785_v44 = vmul.f32 %v1301_v41, %v780_v42  ;;  %v655_v46 = vpack.c.bf16 %v654_v40, %v654_v40 }
 0x54a   : > { %v852_v45 = vmul.f32 %v1299_v39, %v847_v43 }
 0x54b   : > { %v786_v47 = vpack.c.bf16 %v785_v44, %v785_v44  ;;  %657 = vst.msk [vmem:[#allocation4] sm:$0xf] %vm656_vm7, %v655_v46 }
 0x54c   : > { %v853_v48 = vpack.c.bf16 %v852_v45, %v852_v45 }
 0x54d   : > { %788 = vrot.lane.b32.xlu1 %v786_v47, %s1570_s9 }
 0x54e   : > { %855 = vrot.lane.b32.xlu2 %v853_v48, %s1571_s6  ;;  %s1442_s6 = scalar_lea.hbm %s1917_s16, 32 }
 0x54f   : > { %p1444_p3 = scmp.lt.s32.totalorder %s1442_s6, %s1438_s30 }
 0x550   : > { %v782_v49 = vpop.f32.mrf.mxu3 }
 0x551   : > { %v849_v50 = vpop.f32.mrf.mxu1  ;;  %p1445_p5 = por %p1444_p3, %p1443_p2 }
 0x553   : > { %p1446_p7 = pnand %p1445_p5, %p1441_p0 }
 0x597   : > { %v722_v52 = vpop.permute.xlu2 %721 }
 0x598   : > { %725 = vst.msk [vmem:[#allocation4] sm:$0xf] %vm724_vm8, %v722_v52 }
 0x5a8   : > { %v856_v55 = vpop.permute.xlu2 %855 }
 0x5bf   : > { %v789_v54 = vpop.permute.xlu1 %788 }
 0x5c0   : > { %792 = vst.msk [vmem:[#allocation4] sm:$0xf] %vm791_vm9, %v789_v54 }
 0x5c1   : > { %859 = vst.msk [vmem:[#allocation4] sm:$0xf] %vm858_vm10, %v856_v55 }
 0x5c8   : > { %v860_v56 = vld [vmem:[#allocation4] sm:$0xf] }
 0x5c9   : > { %1103 = vmatmul.msk.bf16.vlgmr.msra.gmra.mxu2 %vm577_vm3, %v860_v56 }
 0x64c   : > { %v893_v58 = vpop.f32.mrf.mxu2 }
 0x64d   : > { %v894_v59 = vadd.f32 %v1285_v57, %v893_v58 }
 0x64f   : > { %897 = vst.msk [vmem:[%s308_s7] sm:$0xff] %vm577_vm3, %v894_v59 }
 0x650   : > { %1449 = shalt.err (!%p1446_p7)
}
 0x651   : > { %1135 = dma.vmem_to_hbm [thread:$0]  (%p1672_p6), %s914_s21, 128, %s916_s26, %s899_s24  }
 0x654   : > { %v895_v60 = vpop.f32.mrf.mxu2 }
 0x655 PF: > { %s1919_s4 = sld [smem:[#allocation18_spill]]  ;;  %p1162_p8 = scmp.ge.s32.totalorder %s1552_s28, 2 }
 0x657   : > { %p1152_p9 = pnand %p1162_p8, %p1678_p10 }
 0x659   : > { %p1153_p12 = pneg %p1152_p9 }
 0x65b   : > { %s927_s7 = sand.u32 1, %s1919_s4  }
 0x65c   : > { %s928_s12 = scalar_lea.sflag [#allocation7], %s927_s7 }
 0x65d   : > { %1507 = dma.done.wait (%p1153_p12), %s928_s12, 128  }
 0x65e   : > { %1509 = vsyncadd (%p1153_p12), %s928_s12, 4294967168  ;;  %s23_s28 = sadd.s32 1, %s1552_s28   ;;  %s1921_s24 = sld [smem:[#allocation19_spill]] }
 0x65f   : > { %p20_p13 = scmp.ge.s32.totalorder %s23_s28, 6   ;;  %s1922_s26 = sld [smem:[#allocation21_spill]] }
 0x660   : > { %s1923_s8 = sld [smem:[#allocation22_spill]]  ;;  %s1924_s18 = smov %s1516_s19 }
 0x661   : > { %s1925_s19 = smov %s1520_s20  ;;  %s1926_s20 = smov %s1745_s3 }
 0x662   : > { %s1927_s21 = smov %s1528_s22  ;;  %s1928_s22 = smov %s1532_s23 }
 0x663   : > { %s1929_s23 = smov %s1742_s11  ;;  %s1930_s25 = smov %s1548_s27 }
 0x664   :  { %22 = sbr.rel (!%p20_p13) target bundleno = 17 (0x11), region = 114 }
 0x666   : > { %s1931_s27 = smov %s1923_s8 }
 0x669   :  { %934 = vsyncpa [#allocation6], 1 }
 0x66a   :  { %936 = vsyncpa [#allocation6 + $0x1], 1 }
 0x66b   :  { %937 = vsyncpa [#allocation9], 1 }
 0x66c   :  { %938 = vsyncpa [#allocation12], 1 }
 0x66d   :  { %939 = vsyncpa [#allocation7], 1 }
 0x66e   :  { %941 = vsyncpa [#allocation7 + $0x1], 1 }

</bundles_post_ra>
